<compile_context>
chip_gen: v5e
topology: v5e:2x2
jax: 0.10.0
libtpu: 0.0.40
codegen_flags: <defaults>
</compile_context>

<pallas_src>
import functools
import math

import jax
import jax.numpy as jnp
from jax.experimental import pallas as pl
from jax.experimental.pallas import tpu as pltpu


def _round_up(x, m):
    return ((x + m - 1) // m) * m


def _cdiv(a, b):
    return -(-a // b)


_SQRT_2_OVER_PI = math.sqrt(2.0 / math.pi)


def _gelu_tanh(x):
    # tanh-approximate GELU (tanh runs on the EUP, essentially free next to the MXU).
    # TODO(synk): nn.GELU() default is the exact erf form; the tanh approximation
    # deviates by <~1e-3.  Switch to lax.erf if/when Mosaic exposes an erf lowering.
    return 0.5 * x * (1.0 + jnp.tanh(_SQRT_2_OVER_PI * (x + 0.044715 * x * x * x)))


def _ffn_kernel(x_ref, w1_ref, b1_ref, w2_ref, b2_ref, o_ref, acc_ref,
                *, compute_dtype, gelu_dtype):
    # x_ref : (tm, Dp)   activation tile (original or compute dtype)
    # w1_ref: (Dp, th)   W1 column chunk
    # b1_ref: (1, th)    f32 bias-1 chunk
    # w2_ref: (th, Dp)   W2 row chunk
    # b2_ref: (1, Dp)    f32 bias 2
    # o_ref : (tm, Dp)   output tile
    # acc_ref:(tm, Dp)   f32 accumulator scratch
    h_idx = pl.program_id(1)

    @pl.when(h_idx == 0)
    def _init():
        acc_ref[...] = jnp.zeros_like(acc_ref)

    x = x_ref[...].astype(compute_dtype)          # in-kernel cast, hidden under MXU
    h = jnp.dot(x, w1_ref[...], preferred_element_type=jnp.float32)
    h = h + b1_ref[...]                           # bias add on the f32 accumulator
    h = _gelu_tanh(h.astype(gelu_dtype))          # bf16 GELU on the bf16 path
    # TODO(synk): training-mode dropout (pltpu.prng_seed + stateful_bernoulli) is
    # not implemented; the inference path treats nn.Dropout as identity.
    h = h.astype(w2_ref.dtype)
    acc_ref[...] += jnp.dot(h, w2_ref[...], preferred_element_type=jnp.float32)

    @pl.when(h_idx == pl.num_programs(1) - 1)
    def _finalize():
        o_ref[...] = (acc_ref[...] + b2_ref[...]).astype(o_ref.dtype)


def prepare_params(params, compute_dtype=jnp.bfloat16):
    """One-time parameter prep (pad to lane-dense multiples of 128 + dtype cast)."""
    w1, b1, w2, b2 = params          # w1: (D, H), b1: (H,), w2: (H, D), b2: (D,)
    D, H = w1.shape
    Dp, Hp = _round_up(D, 128), _round_up(H, 128)
    w1p = jnp.pad(w1.astype(compute_dtype), ((0, Dp - D), (0, Hp - H)))
    w2p = jnp.pad(w2.astype(compute_dtype), ((0, Hp - H), (0, Dp - D)))
    b1p = jnp.pad(b1.astype(jnp.float32), (0, Hp - H)).reshape(1, Hp)
    b2p = jnp.pad(b2.astype(jnp.float32), (0, Dp - D)).reshape(1, Dp)
    return (w1p, b1p, w2p, b2p), (D, H)


def _choose_row_tile(M, *, tm_max=512, two_core_min_rows=128):
    """Largest row tile <= tm_max with <8 rows of padding per tile; when the
    whole problem would fit in one tile, split into 2 so both v7x cores work."""
    M8 = _round_up(max(M, 1), 8)
    n = _cdiv(M8, tm_max)
    if n == 1 and M8 >= two_core_min_rows:
        n = 2
    return _round_up(_cdiv(M8, n), 8)


def _vmem_bytes_estimate(tm, Dp, th, w_isz, x_isz, o_isz, g_isz):
    # Conservative: assume streamed blocks are double-buffered and count ~3 live
    # (tm, th) temporaries (f32 matmul result, GELU value, cast copy).
    weights = 2 * 2 * Dp * th * w_isz
    biases = 2 * (th + Dp) * 4
    x_tiles = 2 * tm * Dp * x_isz
    o_tiles = 2 * tm * Dp * o_isz
    acc = tm * Dp * 4
    hidden = tm * th * (4 + g_isz + w_isz)
    return weights + biases + x_tiles + o_tiles + acc + hidden


def _choose_hidden_tile(Hp, budget, est_fn):
    cands = [Hp] + [c for c in (4096, 2048, 1024, 512, 256, 128)
                    if c < Hp and Hp % c == 0]
    for th in cands:
        if est_fn(th) <= budget:
            return th
    return cands[-1]


def _build_and_call(kernel, inputs, *, grid, tm, th, Dp, Mp, out_dtype,
                    vmem_limit, cost, single_buffer_resident):
    nh = grid[1]

    def spec(shape, index_map, constant):
        if constant and single_buffer_resident:
            return pl.BlockSpec(shape, index_map, pipeline_mode=pl.Buffered(1))
        return pl.BlockSpec(shape, index_map)

    in_specs = [
        spec((tm, Dp), lambda i, h: (i, 0), False),     # x, resident per M tile
        spec((Dp, th), lambda i, h: (0, h), nh == 1),   # W1 chunk (resident iff nh==1)
        spec((1, th), lambda i, h: (0, h), nh == 1),    # b1 chunk
        spec((th, Dp), lambda i, h: (h, 0), nh == 1),   # W2 chunk
        spec((1, Dp), lambda i, h: (0, 0), True),       # b2, always constant
    ]
    return pl.pallas_call(
        kernel,
        out_shape=jax.ShapeDtypeStruct((Mp, Dp), out_dtype),
        grid=grid,
        in_specs=in_specs,
        out_specs=pl.BlockSpec((tm, Dp), lambda i, h: (i, 0)),
        scratch_shapes=[pltpu.VMEM((tm, Dp), jnp.float32)],
        compiler_params=pltpu.CompilerParams(
            dimension_semantics=("parallel", "arbitrary"),
            vmem_limit_bytes=vmem_limit),
        cost_estimate=cost,
    )(*inputs)


def ffn_forward(x, prepared, orig_dims, *, tm_max=512,
                compute_dtype=jnp.bfloat16, gelu_dtype=None, out_dtype=None):
    """FFN forward: gelu(x @ W1 + b1) @ W2 + b2, dropout as identity (inference)."""
    w1p, b1p, w2p, b2p = prepared
    D, H = orig_dims
    Dp, Hp = w1p.shape
    B, S, D_in = x.shape
    assert D_in == D

    if out_dtype is None:
        out_dtype = x.dtype
    if gelu_dtype is None:
        # bf16 bias+GELU on the bf16 path (v6e/v7x have bf16 VPU/EUP);
        # pass gelu_dtype=jnp.float32 explicitly on v5e.
        gelu_dtype = jnp.float32 if compute_dtype == jnp.float32 else compute_dtype

    M = B * S
    w_isz = jnp.dtype(compute_dtype).itemsize
    o_isz = jnp.dtype(out_dtype).itemsize
    g_isz = jnp.dtype(gelu_dtype).itemsize
    x_isz = max(jnp.dtype(x.dtype).itemsize, w_isz)   # conservative

    try:
        vmem_cap = int(pltpu.get_tpu_info().vmem_capacity_bytes)
    except Exception:
        vmem_cap = 64 * 1024 * 1024                   # v7x per-core floor
    budget = int(0.55 * vmem_cap)

    # Pick (tm, th) so the conservative VMEM estimate fits the budget.
    tm = _choose_row_tile(M, tm_max=tm_max)
    while True:
        def est(th_, _tm=tm):
            return _vmem_bytes_estimate(_tm, Dp, th_, w_isz, x_isz, o_isz, g_isz)
        th = _choose_hidden_tile(Hp, budget, est)
        if est(th) <= budget or tm <= 128:
            break
        tm = max(128, _round_up(tm // 2, 8))

    Mp = _round_up(_round_up(M, 8), tm)
    n_m_tiles = Mp // tm
    nh = Hp // th

    # Skip the wrapper-side pad/cast copy in the aligned common case; when a pad
    # is needed, fold the compute-dtype cast into the same pass.
    xf = x.reshape(M, D)
    if M == Mp and D == Dp:
        xp = xf                                        # cast happens in the kernel
    else:
        xp = jnp.pad(xf.astype(compute_dtype), ((0, Mp - M), (0, Dp - D)))

    est_bytes = int(_vmem_bytes_estimate(tm, Dp, th, w_isz, x_isz, o_isz, g_isz))
    vmem_limit = int(min(0.85 * vmem_cap,
                         max(32 * 1024 * 1024, 1.3 * est_bytes + (4 << 20))))

    weight_bytes = 2 * Dp * Hp * w_isz
    cost = pl.CostEstimate(
        flops=int(4 * Mp * Dp * Hp),                   # two matmuls
        transcendentals=int(Mp * Hp),                  # one tanh per hidden element
        bytes_accessed=int(Mp * Dp * jnp.dtype(xp.dtype).itemsize
                           + Mp * Dp * o_isz
                           + weight_bytes * (1 if nh == 1 else n_m_tiles)
                           + (Hp + Dp) * 4),
    )

    kernel = functools.partial(_ffn_kernel, compute_dtype=compute_dtype,
                               gelu_dtype=gelu_dtype)
    inputs = (xp, w1p, b1p, w2p, b2p)
    kwargs = dict(grid=(n_m_tiles, nh), tm=tm, th=th, Dp=Dp, Mp=Mp,
                  out_dtype=out_dtype, vmem_limit=vmem_limit, cost=cost)

    single_buf = (nh == 1) and hasattr(pl, "Buffered")
    try:
        out = _build_and_call(kernel, inputs, single_buffer_resident=single_buf,
                              **kwargs)
    except Exception:
        if not single_buf:
            raise
        out = _build_and_call(kernel, inputs, single_buffer_resident=False,
                              **kwargs)

    if M != Mp or D != Dp:
        out = out[:M, :D]
    return out.reshape(B, S, D)


def ffn_reference(x, params):
    """Pure-JAX reference (same GELU formula as the kernel)."""
    w1, b1, w2, b2 = params
    h = _gelu_tanh(x @ w1 + b1)
    return h @ w2 + b2


def init_params(key, d_model):
    """Deterministic init matching nn.Linear defaults (uniform +/- 1/sqrt(fan_in))."""
    h = 4 * d_model
    k1, k2, k3, k4 = jax.random.split(key, 4)
    b1_bound = 1.0 / math.sqrt(d_model)
    w1 = jax.random.uniform(k1, (d_model, h), minval=-b1_bound, maxval=b1_bound,
                            dtype=jnp.float32)
    b1 = jax.random.uniform(k2, (h,), minval=-b1_bound, maxval=b1_bound,
                            dtype=jnp.float32)
    b2_bound = 1.0 / math.sqrt(h)
    w2 = jax.random.uniform(k3, (h, d_model), minval=-b2_bound, maxval=b2_bound,
                            dtype=jnp.float32)
    b2 = jax.random.uniform(k4, (d_model,), minval=-b2_bound, maxval=b2_bound,
                            dtype=jnp.float32)
    return w1, b1, w2, b2


if __name__ == "__main__":
    key = jax.random.PRNGKey(0)
    k_x, k_p, k_x2, k_p2 = jax.random.split(key, 4)

    # FFN inside a ViT Block sees (batch, seq, d_model).  Small shapes.
    B, S, d_model = 2, 8, 32
    x = jax.random.normal(k_x, (B, S, d_model), dtype=jnp.float32)
    params = init_params(k_p, d_model)
    ref = ffn_reference(x, params)

    # f32 compute path: near-exact check against the pure-JAX reference.
    prep_f32, dims = prepare_params(params, compute_dtype=jnp.float32)
    out_f32 = jax.block_until_ready(
        ffn_forward(x, prep_f32, dims, compute_dtype=jnp.float32))
    assert out_f32.shape == (B, S, d_model)
    assert jnp.allclose(out_f32, ref, atol=2e-4, rtol=2e-4), \
        float(jnp.max(jnp.abs(out_f32 - ref)))

    # bf16 compute path (performance-preferred: bf16 MXU inputs + bf16 GELU,
    # f32 accumulation).  Divergence from the f32 reference is intentional.
    prep_bf16, _ = prepare_params(params, compute_dtype=jnp.bfloat16)
    out_bf16 = jax.block_until_ready(
        ffn_forward(x, prep_bf16, dims, compute_dtype=jnp.bfloat16))
    assert out_bf16.shape == (B, S, d_model)
    assert jnp.allclose(out_bf16, ref, atol=4e-2, rtol=4e-2), \
        float(jnp.max(jnp.abs(out_bf16 - ref)))

    # Lane-aligned shape (d_model % 128 == 0, M >= 128): exercises the no-pad
    # fast path, the in-kernel dtype cast, and the 2-tile megacore split.
    B2, S2, d_model2 = 2, 128, 128
    x2 = jax.random.normal(k_x2, (B2, S2, d_model2), dtype=jnp.float32)
    params2 = init_params(k_p2, d_model2)
    ref2 = ffn_reference(x2, params2)
    prep2, dims2 = prepare_params(params2, compute_dtype=jnp.float32)
    out2 = jax.block_until_ready(
        ffn_forward(x2, prep2, dims2, compute_dtype=jnp.float32))
    assert out2.shape == (B2, S2, d_model2)
    assert jnp.allclose(out2, ref2, atol=2e-3, rtol=2e-3), \
        float(jnp.max(jnp.abs(out2 - ref2)))

    print("KERNEL_OK")
</pallas_src>

<mosaic_0001>
module attributes {stable_mosaic.version = 11 : i64} {
  func.func @_ffn_kernel(%arg0: i32, %arg1: i32, %arg2: memref<16x128xf32, #tpu.memory_space<vmem>>, %arg3: memref<128x128xf32, #tpu.memory_space<vmem>>, %arg4: memref<1x128xf32, #tpu.memory_space<vmem>>, %arg5: memref<128x128xf32, #tpu.memory_space<vmem>>, %arg6: memref<1x128xf32, #tpu.memory_space<vmem>>, %arg7: memref<16x128xf32, #tpu.memory_space<vmem>>, %arg8: memref<16x128xf32, #tpu.memory_space<vmem>>) attributes {dimension_semantics = [#tpu.dimension_semantics<parallel>, #tpu.dimension_semantics<arbitrary>], iteration_bounds = array<i64: 1, 1>, scalar_prefetch = 0 : i64, scratch_operands = 1 : i64, tpu.core_type = #tpu.core_type<tc>, window_params = [{transform_indices = @transform_0, window_bounds = array<i64: 16, 128>}, {pipeline_mode = #tpu.pipeline_mode<synchronous>, transform_indices = @transform_1, window_bounds = array<i64: 128, 128>}, {pipeline_mode = #tpu.pipeline_mode<synchronous>, transform_indices = @transform_2, window_bounds = array<i64: 1, 128>}, {pipeline_mode = #tpu.pipeline_mode<synchronous>, transform_indices = @transform_3, window_bounds = array<i64: 128, 128>}, {pipeline_mode = #tpu.pipeline_mode<synchronous>, transform_indices = @transform_4, window_bounds = array<i64: 1, 128>}, {transform_indices = @transform_5, window_bounds = array<i64: 16, 128>}]} {
    %c0_i32 = arith.constant 0 : i32
    %0 = arith.cmpi eq, %arg1, %c0_i32 : i32
    %1 = arith.extui %0 : i1 to i32
    %c0_i32_0 = arith.constant 0 : i32
    %2 = arith.cmpi ne, %1, %c0_i32_0 : i32
    scf.if %2 {
      %cst_19 = arith.constant 0.000000e+00 : f32
      %30 = vector.broadcast %cst_19 : f32 to vector<16x128xf32>
      %c0_20 = arith.constant 0 : index
      %c0_21 = arith.constant 0 : index
      %31 = vector.load %arg8[%c0_20, %c0_21] : memref<16x128xf32, #tpu.memory_space<vmem>>, vector<16x128xf32>
      tpu.vector_store %arg8[%c0_20, %c0_21], %30 {strides = array<i32>} : memref<16x128xf32, #tpu.memory_space<vmem>>, vector<16x128xf32>,
    } else {
    }
    %c0 = arith.constant 0 : index
    %c0_1 = arith.constant 0 : index
    %3 = vector.load %arg2[%c0, %c0_1] : memref<16x128xf32, #tpu.memory_space<vmem>>, vector<16x128xf32>
    %c0_2 = arith.constant 0 : index
    %c0_3 = arith.constant 0 : index
    %4 = vector.load %arg3[%c0_2, %c0_3] : memref<128x128xf32, #tpu.memory_space<vmem>>, vector<128x128xf32>
    %cst = arith.constant dense<0.000000e+00> : vector<16x128xf32>
    %5 = tpu.matmul %3, %4, %cst {dimension_numbers = #tpu.dot_dimension_numbers<[1], [0], [0], [1], [0, 0, 1, 1], [], []>} : vector<16x128xf32>, vector<128x128xf32>, vector<16x128xf32> -> vector<16x128xf32>
    %c0_4 = arith.constant 0 : index
    %c0_5 = arith.constant 0 : index
    %6 = vector.load %arg4[%c0_4, %c0_5] : memref<1x128xf32, #tpu.memory_space<vmem>>, vector<1x128xf32>
    %7 = vector.broadcast %6 : vector<1x128xf32> to vector<16x128xf32>
    %8 = arith.addf %5, %7 : vector<16x128xf32>
    %cst_6 = arith.constant 5.000000e-01 : f32
    %9 = vector.broadcast %cst_6 : f32 to vector<16x128xf32>
    %10 = arith.mulf %9, %8 : vector<16x128xf32>
    %cst_7 = arith.constant 4.471500e-02 : f32
    %11 = vector.broadcast %cst_7 : f32 to vector<16x128xf32>
    %12 = arith.mulf %11, %8 : vector<16x128xf32>
    %13 = arith.mulf %12, %8 : vector<16x128xf32>
    %14 = arith.mulf %13, %8 : vector<16x128xf32>
    %15 = arith.addf %8, %14 : vector<16x128xf32>
    %cst_8 = arith.constant 0.797884583 : f32
    %16 = vector.broadcast %cst_8 : f32 to vector<16x128xf32>
    %17 = arith.mulf %16, %15 : vector<16x128xf32>
    %18 = math.tanh %17 : vector<16x128xf32>
    %cst_9 = arith.constant 1.000000e+00 : f32
    %19 = vector.broadcast %cst_9 : f32 to vector<16x128xf32>
    %20 = arith.addf %19, %18 : vector<16x128xf32>
    %21 = arith.mulf %10, %20 : vector<16x128xf32>
    %c0_10 = arith.constant 0 : index
    %c0_11 = arith.constant 0 : index
    %22 = vector.load %arg8[%c0_10, %c0_11] : memref<16x128xf32, #tpu.memory_space<vmem>>, vector<16x128xf32>
    %c0_12 = arith.constant 0 : index
    %c0_13 = arith.constant 0 : index
    %23 = vector.load %arg5[%c0_12, %c0_13] : memref<128x128xf32, #tpu.memory_space<vmem>>, vector<128x128xf32>
    %cst_14 = arith.constant dense<0.000000e+00> : vector<16x128xf32>
    %24 = tpu.matmul %21, %23, %cst_14 {dimension_numbers = #tpu.dot_dimension_numbers<[1], [0], [0], [1], [0, 0, 1, 1], [], []>} : vector<16x128xf32>, vector<128x128xf32>, vector<16x128xf32> -> vector<16x128xf32>
    %25 = arith.addf %22, %24 : vector<16x128xf32>
    %c0_15 = arith.constant 0 : index
    %c0_16 = arith.constant 0 : index
    %26 = vector.load %arg8[%c0_15, %c0_16] : memref<16x128xf32, #tpu.memory_space<vmem>>, vector<16x128xf32>
    tpu.vector_store %arg8[%c0_15, %c0_16], %25 {strides = array<i32>} : memref<16x128xf32, #tpu.memory_space<vmem>>, vector<16x128xf32>,
    %c0_i32_17 = arith.constant 0 : i32
    %27 = arith.cmpi eq, %arg1, %c0_i32_17 : i32
    %28 = arith.extui %27 : i1 to i32
    %c0_i32_18 = arith.constant 0 : i32
    %29 = arith.cmpi ne, %28, %c0_i32_18 : i32
    scf.if %29 {
      %c0_19 = arith.constant 0 : index
      %c0_20 = arith.constant 0 : index
      %30 = vector.load %arg8[%c0_19, %c0_20] : memref<16x128xf32, #tpu.memory_space<vmem>>, vector<16x128xf32>
      %c0_21 = arith.constant 0 : index
      %c0_22 = arith.constant 0 : index
      %31 = vector.load %arg6[%c0_21, %c0_22] : memref<1x128xf32, #tpu.memory_space<vmem>>, vector<1x128xf32>
      %32 = vector.broadcast %31 : vector<1x128xf32> to vector<16x128xf32>
      %33 = arith.addf %30, %32 : vector<16x128xf32>
      %c0_23 = arith.constant 0 : index
      %c0_24 = arith.constant 0 : index
      %34 = vector.load %arg7[%c0_23, %c0_24] : memref<16x128xf32, #tpu.memory_space<vmem>>, vector<16x128xf32>
      tpu.vector_store %arg7[%c0_23, %c0_24], %33 {strides = array<i32>} : memref<16x128xf32, #tpu.memory_space<vmem>>, vector<16x128xf32>,
    } else {
    }
    return
  }
  func.func @transform_0(%arg0: i32, %arg1: i32) -> (i32, i32) {
    %c0_i32 = arith.constant 0 : i32
    %c0_i32_0 = arith.constant 0 : i32
    return %arg0, %c0_i32 : i32, i32
  }
  func.func @transform_1(%arg0: i32, %arg1: i32) -> (i32, i32) {
    %c0_i32 = arith.constant 0 : i32
    %c0_i32_0 = arith.constant 0 : i32
    return %c0_i32, %arg1 : i32, i32
  }
  func.func @transform_2(%arg0: i32, %arg1: i32) -> (i32, i32) {
    %c0_i32 = arith.constant 0 : i32
    %c0_i32_0 = arith.constant 0 : i32
    return %c0_i32, %arg1 : i32, i32
  }
  func.func @transform_3(%arg0: i32, %arg1: i32) -> (i32, i32) {
    %c0_i32 = arith.constant 0 : i32
    %c0_i32_0 = arith.constant 0 : i32
    return %arg1, %c0_i32 : i32, i32
  }
  func.func @transform_4(%arg0: i32, %arg1: i32) -> (i32, i32) {
    %c0_i32 = arith.constant 0 : i32
    %c0_i32_0 = arith.constant 0 : i32
    %c0_i32_1 = arith.constant 0 : i32
    return %c0_i32, %c0_i32_0 : i32, i32
  }
  func.func @transform_5(%arg0: i32, %arg1: i32) -> (i32, i32) {
    %c0_i32 = arith.constant 0 : i32
    %c0_i32_0 = arith.constant 0 : i32
    return %arg0, %c0_i32 : i32, i32
  }
}

module attributes {stable_mosaic.version = 11 : i64} {
  func.func @_ffn_kernel(%arg0: i32, %arg1: i32, %arg2: memref<16x128xf32, #tpu.memory_space<vmem>>, %arg3: memref<128x128xf32, #tpu.memory_space<vmem>>, %arg4: memref<1x128xf32, #tpu.memory_space<vmem>>, %arg5: memref<128x128xf32, #tpu.memory_space<vmem>>, %arg6: memref<1x128xf32, #tpu.memory_space<vmem>>, %arg7: memref<16x128xf32, #tpu.memory_space<vmem>>, %arg8: memref<16x128xf32, #tpu.memory_space<vmem>>) attributes {dimension_semantics = [#tpu.dimension_semantics<parallel>, #tpu.dimension_semantics<arbitrary>], iteration_bounds = array<i64: 1, 1>, scalar_prefetch = 0 : i64, scratch_operands = 1 : i64, tpu.core_type = #tpu.core_type<tc>, window_params = [{transform_indices = @transform_0, window_bounds = array<i64: 16, 128>}, {transform_indices = @transform_1, window_bounds = array<i64: 128, 128>}, {transform_indices = @transform_2, window_bounds = array<i64: 1, 128>}, {transform_indices = @transform_3, window_bounds = array<i64: 128, 128>}, {pipeline_mode = #tpu.pipeline_mode<synchronous>, transform_indices = @transform_4, window_bounds = array<i64: 1, 128>}, {transform_indices = @transform_5, window_bounds = array<i64: 16, 128>}]} {
    %c0_i32 = arith.constant 0 : i32
    %0 = arith.cmpi eq, %arg1, %c0_i32 : i32
    %1 = arith.extui %0 : i1 to i32
    %c0_i32_0 = arith.constant 0 : i32
    %2 = arith.cmpi ne, %1, %c0_i32_0 : i32
    scf.if %2 {
      %cst_19 = arith.constant 0.000000e+00 : f32
      %30 = vector.broadcast %cst_19 : f32 to vector<16x128xf32>
      %c0_20 = arith.constant 0 : index
      %c0_21 = arith.constant 0 : index
      %31 = vector.load %arg8[%c0_20, %c0_21] : memref<16x128xf32, #tpu.memory_space<vmem>>, vector<16x128xf32>
      tpu.vector_store %arg8[%c0_20, %c0_21], %30 {strides = array<i32>} : memref<16x128xf32, #tpu.memory_space<vmem>>, vector<16x128xf32>,
    } else {
    }
    %c0 = arith.constant 0 : index
    %c0_1 = arith.constant 0 : index
    %3 = vector.load %arg2[%c0, %c0_1] : memref<16x128xf32, #tpu.memory_space<vmem>>, vector<16x128xf32>
    %c0_2 = arith.constant 0 : index
    %c0_3 = arith.constant 0 : index
    %4 = vector.load %arg3[%c0_2, %c0_3] : memref<128x128xf32, #tpu.memory_space<vmem>>, vector<128x128xf32>
    %cst = arith.constant dense<0.000000e+00> : vector<16x128xf32>
    %5 = tpu.matmul %3, %4, %cst {dimension_numbers = #tpu.dot_dimension_numbers<[1], [0], [0], [1], [0, 0, 1, 1], [], []>} : vector<16x128xf32>, vector<128x128xf32>, vector<16x128xf32> -> vector<16x128xf32>
    %c0_4 = arith.constant 0 : index
    %c0_5 = arith.constant 0 : index
    %6 = vector.load %arg4[%c0_4, %c0_5] : memref<1x128xf32, #tpu.memory_space<vmem>>, vector<1x128xf32>
    %7 = vector.broadcast %6 : vector<1x128xf32> to vector<16x128xf32>
    %8 = arith.addf %5, %7 : vector<16x128xf32>
    %cst_6 = arith.constant 5.000000e-01 : f32
    %9 = vector.broadcast %cst_6 : f32 to vector<16x128xf32>
    %10 = arith.mulf %9, %8 : vector<16x128xf32>
    %cst_7 = arith.constant 4.471500e-02 : f32
    %11 = vector.broadcast %cst_7 : f32 to vector<16x128xf32>
    %12 = arith.mulf %11, %8 : vector<16x128xf32>
    %13 = arith.mulf %12, %8 : vector<16x128xf32>
    %14 = arith.mulf %13, %8 : vector<16x128xf32>
    %15 = arith.addf %8, %14 : vector<16x128xf32>
    %cst_8 = arith.constant 0.797884583 : f32
    %16 = vector.broadcast %cst_8 : f32 to vector<16x128xf32>
    %17 = arith.mulf %16, %15 : vector<16x128xf32>
    %18 = math.tanh %17 : vector<16x128xf32>
    %cst_9 = arith.constant 1.000000e+00 : f32
    %19 = vector.broadcast %cst_9 : f32 to vector<16x128xf32>
    %20 = arith.addf %19, %18 : vector<16x128xf32>
    %21 = arith.mulf %10, %20 : vector<16x128xf32>
    %c0_10 = arith.constant 0 : index
    %c0_11 = arith.constant 0 : index
    %22 = vector.load %arg8[%c0_10, %c0_11] : memref<16x128xf32, #tpu.memory_space<vmem>>, vector<16x128xf32>
    %c0_12 = arith.constant 0 : index
    %c0_13 = arith.constant 0 : index
    %23 = vector.load %arg5[%c0_12, %c0_13] : memref<128x128xf32, #tpu.memory_space<vmem>>, vector<128x128xf32>
    %cst_14 = arith.constant dense<0.000000e+00> : vector<16x128xf32>
    %24 = tpu.matmul %21, %23, %cst_14 {dimension_numbers = #tpu.dot_dimension_numbers<[1], [0], [0], [1], [0, 0, 1, 1], [], []>} : vector<16x128xf32>, vector<128x128xf32>, vector<16x128xf32> -> vector<16x128xf32>
    %25 = arith.addf %22, %24 : vector<16x128xf32>
    %c0_15 = arith.constant 0 : index
    %c0_16 = arith.constant 0 : index
    %26 = vector.load %arg8[%c0_15, %c0_16] : memref<16x128xf32, #tpu.memory_space<vmem>>, vector<16x128xf32>
    tpu.vector_store %arg8[%c0_15, %c0_16], %25 {strides = array<i32>} : memref<16x128xf32, #tpu.memory_space<vmem>>, vector<16x128xf32>,
    %c0_i32_17 = arith.constant 0 : i32
    %27 = arith.cmpi eq, %arg1, %c0_i32_17 : i32
    %28 = arith.extui %27 : i1 to i32
    %c0_i32_18 = arith.constant 0 : i32
    %29 = arith.cmpi ne, %28, %c0_i32_18 : i32
    scf.if %29 {
      %c0_19 = arith.constant 0 : index
      %c0_20 = arith.constant 0 : index
      %30 = vector.load %arg8[%c0_19, %c0_20] : memref<16x128xf32, #tpu.memory_space<vmem>>, vector<16x128xf32>
      %c0_21 = arith.constant 0 : index
      %c0_22 = arith.constant 0 : index
      %31 = vector.load %arg6[%c0_21, %c0_22] : memref<1x128xf32, #tpu.memory_space<vmem>>, vector<1x128xf32>
      %32 = vector.broadcast %31 : vector<1x128xf32> to vector<16x128xf32>
      %33 = arith.addf %30, %32 : vector<16x128xf32>
      %c0_23 = arith.constant 0 : index
      %c0_24 = arith.constant 0 : index
      %34 = vector.load %arg7[%c0_23, %c0_24] : memref<16x128xf32, #tpu.memory_space<vmem>>, vector<16x128xf32>
      tpu.vector_store %arg7[%c0_23, %c0_24], %33 {strides = array<i32>} : memref<16x128xf32, #tpu.memory_space<vmem>>, vector<16x128xf32>,
    } else {
    }
    return
  }
  func.func @transform_0(%arg0: i32, %arg1: i32) -> (i32, i32) {
    %c0_i32 = arith.constant 0 : i32
    %c0_i32_0 = arith.constant 0 : i32
    return %arg0, %c0_i32 : i32, i32
  }
  func.func @transform_1(%arg0: i32, %arg1: i32) -> (i32, i32) {
    %c0_i32 = arith.constant 0 : i32
    %c0_i32_0 = arith.constant 0 : i32
    return %c0_i32, %arg1 : i32, i32
  }
  func.func @transform_2(%arg0: i32, %arg1: i32) -> (i32, i32) {
    %c0_i32 = arith.constant 0 : i32
    %c0_i32_0 = arith.constant 0 : i32
    return %c0_i32, %arg1 : i32, i32
  }
  func.func @transform_3(%arg0: i32, %arg1: i32) -> (i32, i32) {
    %c0_i32 = arith.constant 0 : i32
    %c0_i32_0 = arith.constant 0 : i32
    return %arg1, %c0_i32 : i32, i32
  }
  func.func @transform_4(%arg0: i32, %arg1: i32) -> (i32, i32) {
    %c0_i32 = arith.constant 0 : i32
    %c0_i32_0 = arith.constant 0 : i32
    %c0_i32_1 = arith.constant 0 : i32
    return %c0_i32, %c0_i32_0 : i32, i32
  }
  func.func @transform_5(%arg0: i32, %arg1: i32) -> (i32, i32) {
    %c0_i32 = arith.constant 0 : i32
    %c0_i32_0 = arith.constant 0 : i32
    return %arg0, %c0_i32 : i32, i32
  }
}

</mosaic_0001>

<bundles_post_ra>
// kernel: tpu_custom_call.1
= control target key start
LH: loop header
LB: loop body
LE: loop exit
PB: predicated region body
PF: predicated region fallthrough
CT: control target
= control target key end

     0   :  { %10 = vsyncpa [#allocation4], 0  ;;  %s427_s0 = inlined_call_operand.hbm [shape: f32[16,128], index: 0, kind: input, shape index: {}]   ;;  %s428_s1 = inlined_call_operand.hbm [shape: f32[128,128], index: 1, kind: input, shape index: {}]   ;;  %s429_s2 = inlined_call_operand.vmem [shape: f32[1,128], index: 2, kind: input, shape index: {}]   ;;  %s430_s3 = inlined_call_operand.hbm [shape: f32[128,128], index: 3, kind: input, shape index: {}]   ;;  %s431_s4 = inlined_call_operand.vmem [shape: f32[1,128], index: 4, kind: input, shape index: {}]   ;;  %s432_s5 = inlined_call_operand.hbm [shape: f32[16,128], index: 5, kind: output, shape index: {}]  }
   0x1   :  { %11 = vsyncpa [#allocation7], 0 }
   0x2   :  { %12 = vsyncpa [#allocation5], 0  ;;  %s30_s20 = sshll.u32 %s428_s1, 4  ;;  %s361_s21 = smov [#allocation6]   ;;  %s31_s20 = int_to_ptr.hbm [resolvable:$true] %s30_s20 }
   0x3   :  { %s32_s22 = sshll.u32 %s361_s21, 4  ;;  %s17_s25 = sshll.u32 %s427_s0, 4  ;;  %s33_s22 = int_to_ptr.vmem [resolvable:$true] %s32_s22  ;;  %s18_s25 = int_to_ptr.hbm [resolvable:$true] %s17_s25 }
   0x4   :  { %s362_s26 = smov 128   ;;  %s363_s27 = smov 8  }
   0x5   :  { %38 = dma.hbm_to_vmem [thread:$0]  %s31_s20, 2048, %s33_s22, [#allocation7], %s362_s26, %s362_s26, %s363_s27  }
   0x6   :  { %s364_s28 = smov [#allocation3]   ;;  %s45_s1 = sshll.u32 %s430_s3, 4  ;;  %s46_s1 = int_to_ptr.hbm [resolvable:$true] %s45_s1 }
   0x7   :  { %s19_s29 = sshll.u32 %s364_s28, 4  ;;  %s365_s0 = smov [#allocation8]   ;;  %s20_s29 = int_to_ptr.vmem [resolvable:$true] %s19_s29 }
   0x8   :  { %25 = dma.hbm_to_vmem [thread:$0]  %s18_s25, 256, %s20_s29, [#allocation4], %s362_s26, %s362_s26, %s363_s27  }
   0x9   :  { %s47_s7 = sshll.u32 %s365_s0, 4  ;;  %s48_s7 = int_to_ptr.vmem [resolvable:$true] %s47_s7 }
   0xa   :  { %53 = dma.hbm_to_vmem [thread:$0]  %s46_s1, 2048, %s48_s7, [#allocation7], %s362_s26, %s362_s26, %s363_s27  }
   0xb   :  { %355 = dma.done.wait [#allocation4], 256  }
   0xc   :  { %356 = vsyncadd [#allocation4], 4294967040 }
   0xd   :  { %357 = dma.done.wait [#allocation7], 4096  }
   0xe   :  { %358 = vsyncadd [#allocation7], 4294963200  ;;  %v91_v0 = vld [vmem:[#allocation6 + $0x78] sm:$0xff]  ;;  %v90_v1 = vld [vmem:[#allocation6 + $0x70] sm:$0xff]  ;;  %s366_s10 = smov [#allocation9]   ;;  %s201_s14 = sshll.u32 %s432_s5, 4  ;;  %s202_s14 = int_to_ptr.hbm [resolvable:$true] %s201_s14 }
   0xf   :  { %96 = vmatpush.msra.mxu0 %v91_v0  ;;  %215 = vmatpush.msra.mxu2 %v91_v0  ;;  %v89_v2 = vld [vmem:[#allocation6 + $0x68] sm:$0xff]  ;;  %v88_v3 = vld [vmem:[#allocation6 + $0x60] sm:$0xff]  ;;  %v87_v4 = vld [vmem:[#allocation6 + $0x58] sm:$0xff]  ;;  %s199_s11 = sshll.u32 %s366_s10, 4  ;;  %s200_s11 = int_to_ptr.vmem [resolvable:$true] %s199_s11 }
  0x10   :  { %v154_v5 = vld [vmem:[#allocation8 + $0x78] sm:$0xff]  ;;  %v153_v6 = vld [vmem:[#allocation8 + $0x70] sm:$0xff]  ;;  %v152_v8 = vld [vmem:[#allocation8 + $0x68] sm:$0xff] }
  0x11   :  { %97 = vmatpush.msra.mxu0 %v90_v1  ;;  %216 = vmatpush.msra.mxu2 %v90_v1  ;;  %v86_v7 = vld [vmem:[#allocation6 + $0x50] sm:$0xff]  ;;  %v85_v9 = vld [vmem:[#allocation6 + $0x48] sm:$0xff]  ;;  %v151_v10 = vld [vmem:[#allocation8 + $0x60] sm:$0xff] }
  0x12   :  { %155 = vmatpush.msra.mxu1 %v154_v5  ;;  %231 = vmatpush.msra.mxu3 %v154_v5  ;;  %v84_v11 = vld [vmem:[#allocation6 + $0x40] sm:$0xff]  ;;  %v83_v12 = vld [vmem:[#allocation6 + $0x38] sm:$0xff]  ;;  %v82_v13 = vld [vmem:[#allocation6 + $0x30] sm:$0xff] }
  0x13   :  { %98 = vmatpush.msra.mxu0 %v89_v2  ;;  %217 = vmatpush.msra.mxu2 %v89_v2  ;;  %v81_v14 = vld [vmem:[#allocation6 + $0x28] sm:$0xff]  ;;  %v80_v15 = vld [vmem:[#allocation6 + $0x20] sm:$0xff]  ;;  %v79_v16 = vld [vmem:[#allocation6 + $0x18] sm:$0xff] }
  0x14   :  { %156 = vmatpush.msra.mxu1 %v153_v6  ;;  %232 = vmatpush.msra.mxu3 %v153_v6  ;;  %v78_v17 = vld [vmem:[#allocation6 + $0x10] sm:$0xff]  ;;  %v77_v18 = vld [vmem:[#allocation6 + $0x8] sm:$0xff]  ;;  %v76_v19 = vld [vmem:[#allocation6] sm:$0xff] }
  0x15   :  { %99 = vmatpush.msra.mxu0 %v88_v3  ;;  %218 = vmatpush.msra.mxu2 %v88_v3  ;;  %v74_v20 = vld [vmem:[#allocation3] sm:$0xff]  ;;  %v75_v21 = vld [vmem:[#allocation3 + $0x8] sm:$0xff]  ;;  %v148_v24 = vld [vmem:[#allocation8 + $0x48] sm:$0xff] }
  0x16   :  { %157 = vmatpush.msra.mxu1 %v152_v8  ;;  %233 = vmatpush.msra.mxu3 %v152_v8  ;;  %v150_v22 = vld [vmem:[#allocation8 + $0x58] sm:$0xff]  ;;  %v149_v23 = vld [vmem:[#allocation8 + $0x50] sm:$0xff]  ;;  %v147_v25 = vld [vmem:[#allocation8 + $0x40] sm:$0xff] }
  0x17   :  { %100 = vmatpush.msra.mxu0 %v87_v4  ;;  %219 = vmatpush.msra.mxu2 %v87_v4  ;;  %v146_v26 = vld [vmem:[#allocation8 + $0x38] sm:$0xff]  ;;  %v145_v27 = vld [vmem:[#allocation8 + $0x30] sm:$0xff]  ;;  %v144_v28 = vld [vmem:[#allocation8 + $0x28] sm:$0xff] }
  0x18   :  { %158 = vmatpush.msra.mxu1 %v151_v10  ;;  %234 = vmatpush.msra.mxu3 %v151_v10  ;;  %v143_v29 = vld [vmem:[#allocation8 + $0x20] sm:$0xff]  ;;  %v142_v30 = vld [vmem:[#allocation8 + $0x18] sm:$0xff]  ;;  %v141_v31 = vld [vmem:[#allocation8 + $0x10] sm:$0xff] }
  0x19   :  { %101 = vmatpush.msra.mxu0 %v86_v7  ;;  %220 = vmatpush.msra.mxu2 %v86_v7  ;;  %v140_v32 = vld [vmem:[#allocation8 + $0x8] sm:$0xff]  ;;  %v139_v33 = vld [vmem:[#allocation8] sm:$0xff]  ;;  %v253_v34 = vld [vmem:[%s429_s2] ss:$0 sm:$0xff] }
  0x1a   :  { %159 = vmatpush.msra.mxu1 %v150_v22  ;;  %235 = vmatpush.msra.mxu3 %v150_v22  ;;  %v254_v57 = vld [vmem:[%s431_s4] ss:$0 sm:$0xff] }
  0x1b   :  { %102 = vmatpush.msra.mxu0 %v85_v9  ;;  %221 = vmatpush.msra.mxu2 %v85_v9 }
  0x1c   :  { %160 = vmatpush.msra.mxu1 %v149_v23  ;;  %236 = vmatpush.msra.mxu3 %v149_v23 }
  0x1d   :  { %103 = vmatpush.msra.mxu0 %v84_v11  ;;  %222 = vmatpush.msra.mxu2 %v84_v11 }
  0x1e   :  { %161 = vmatpush.msra.mxu1 %v148_v24  ;;  %237 = vmatpush.msra.mxu3 %v148_v24 }
  0x1f   :  { %104 = vmatpush.msra.mxu0 %v83_v12  ;;  %223 = vmatpush.msra.mxu2 %v83_v12 }
  0x20   :  { %162 = vmatpush.msra.mxu1 %v147_v25  ;;  %238 = vmatpush.msra.mxu3 %v147_v25 }
  0x21   :  { %105 = vmatpush.msra.mxu0 %v82_v13  ;;  %224 = vmatpush.msra.mxu2 %v82_v13 }
  0x22   :  { %163 = vmatpush.msra.mxu1 %v146_v26  ;;  %239 = vmatpush.msra.mxu3 %v146_v26 }
  0x23   :  { %106 = vmatpush.msra.mxu0 %v81_v14  ;;  %225 = vmatpush.msra.mxu2 %v81_v14 }
  0x24   :  { %164 = vmatpush.msra.mxu1 %v145_v27  ;;  %240 = vmatpush.msra.mxu3 %v145_v27 }
  0x25   :  { %107 = vmatpush.msra.mxu0 %v80_v15  ;;  %226 = vmatpush.msra.mxu2 %v80_v15 }
  0x26   :  { %165 = vmatpush.msra.mxu1 %v144_v28  ;;  %241 = vmatpush.msra.mxu3 %v144_v28 }
  0x27   :  { %108 = vmatpush.msra.mxu0 %v79_v16  ;;  %227 = vmatpush.msra.mxu2 %v79_v16 }
  0x28   :  { %166 = vmatpush.msra.mxu1 %v143_v29  ;;  %242 = vmatpush.msra.mxu3 %v143_v29 }
  0x29   :  { %109 = vmatpush.msra.mxu0 %v78_v17  ;;  %228 = vmatpush.msra.mxu2 %v78_v17 }
  0x2a   :  { %167 = vmatpush.msra.mxu1 %v142_v30  ;;  %243 = vmatpush.msra.mxu3 %v142_v30 }
  0x2b   :  { %110 = vmatpush.msra.mxu0 %v77_v18  ;;  %229 = vmatpush.msra.mxu2 %v77_v18 }
  0x2c   :  { %168 = vmatpush.msra.mxu1 %v141_v31  ;;  %244 = vmatpush.msra.mxu3 %v141_v31 }
  0x2d   :  { %111 = vmatpush.msra.mxu0 %v76_v19  ;;  %230 = vmatpush.msra.mxu2 %v76_v19 }
  0x2e   :  { %112 = vmatmul.f32.vlgmr.msra.gmra.mxu0 %v74_v20  ;;  %115 = vmatmul.f32.vlgmr.msra.gmra.mxu2 %v75_v21 }
  0x2f   :  { %169 = vmatpush.msra.mxu1 %v140_v32  ;;  %245 = vmatpush.msra.mxu3 %v140_v32 }
  0x31   :  { %170 = vmatpush.msra.mxu1 %v139_v33  ;;  %246 = vmatpush.msra.mxu3 %v139_v33 }
  0xab   :  { %v113_v35 = vpop.f32.mrf.mxu0 }
  0xac   :  { %v114_v36 = vadd.f32 %v253_v34, %v113_v35 }
  0xae   :  { %v121_v37 = vmul.f32 0.044715, %v114_v36  ;;  %v119_v50 = vmul.f32 0.5, %v114_v36 }
  0xb0   :  { %v123_v38 = vmul.f32 %v121_v37, %v114_v36 }
  0xb1   :  { %v116_v39 = vpop.f32.mrf.mxu2 }
  0xb2   :  { %v117_v40 = vadd.f32 %v253_v34, %v116_v39  ;;  %v125_v41 = vmul.f32 %v123_v38, %v114_v36 }
  0xb4   :  { %v127_v42 = vadd.f32 %v125_v41, %v114_v36  ;;  %v122_v43 = vmul.f32 0.044715, %v117_v40  ;;  %v120_v54 = vmul.f32 0.5, %v117_v40 }
  0xb6   :  { %v129_v44 = vmul.f32 0.7978846, %v127_v42  ;;  %v124_v45 = vmul.f32 %v122_v43, %v117_v40 }
  0xb8   :  { %255 = vtanh.f32 %v129_v44  ;;  %v126_v46 = vmul.f32 %v124_v45, %v117_v40 }
  0xba   :  { %v128_v47 = vadd.f32 %v126_v46, %v117_v40 }
  0xbc   :  { %v130_v48 = vmul.f32 0.7978846, %v128_v47 }
  0xbe   :  { %v256_v49 = vpop.eup %255  ;;  %257 = vtanh.f32 %v130_v48 }
  0xbf   :  { %v133_v51 = vadd.f32 1.0, %v256_v49 }
  0xc1   :  { %v135_v52 = vmul.f32 %v133_v51, %v119_v50 }
  0xc3   :  { %171 = vmatmul.f32.vlgmr.msra.gmra.mxu1 %v135_v52 }
  0xc4   :  { %v258_v53 = vpop.eup %257 }
  0xc5   :  { %v134_v55 = vadd.f32 1.0, %v258_v53 }
  0xc7   :  { %v136_v56 = vmul.f32 %v134_v55, %v120_v54 }
  0xc9   :  { %174 = vmatmul.f32.vlgmr.msra.gmra.mxu3 %v136_v56 }
 0x140   :  { %v172_v58 = vpop.f32.mrf.mxu1 }
 0x141   :  { %v191_v59 = vadd.f32 %v254_v57, %v172_v58 }
 0x143   :  { %193 = vst [vmem:[#allocation9] sm:$0xff] %v191_v59 }
 0x14c   :  { %v175_v60 = vpop.f32.mrf.mxu3 }
 0x14d   :  { %v192_v61 = vadd.f32 %v254_v57, %v175_v60 }
 0x14f   :  { %194 = vst [vmem:[#allocation9 + $0x8] sm:$0xff] %v192_v61 }
 0x150   :  { %207 = dma.vmem_to_hbm [thread:$0]  %s200_s11, 256, %s202_s14, [#allocation5], %s362_s26, %s362_s26, %s363_s27  }
 0x151   :  { %359 = dma.done.wait [#allocation5], 256  }
 0x152   :  { %360 = vsyncadd [#allocation5], 4294967040 }
 0x153   :  { %212 = vsyncpa [#allocation4], 1 }
 0x154   :  { %213 = vsyncpa [#allocation7], 1 }
 0x155   :  { %214 = vsyncpa [#allocation5], 1 }

// kernel: tpu_custom_call.1
= control target key start
LH: loop header
LB: loop body
LE: loop exit
PB: predicated region body
PF: predicated region fallthrough
CT: control target
= control target key end

     0   :  { %10 = vsyncpa [#allocation4], 0  ;;  %s427_s0 = inlined_call_operand.hbm [shape: f32[16,128], index: 0, kind: input, shape index: {}]   ;;  %s428_s1 = inlined_call_operand.hbm [shape: f32[128,128], index: 1, kind: input, shape index: {}]   ;;  %s429_s2 = inlined_call_operand.vmem [shape: f32[1,128], index: 2, kind: input, shape index: {}]   ;;  %s430_s3 = inlined_call_operand.hbm [shape: f32[128,128], index: 3, kind: input, shape index: {}]   ;;  %s431_s4 = inlined_call_operand.vmem [shape: f32[1,128], index: 4, kind: input, shape index: {}]   ;;  %s432_s5 = inlined_call_operand.hbm [shape: f32[16,128], index: 5, kind: output, shape index: {}]  }
   0x1   :  { %11 = vsyncpa [#allocation7], 0 }
   0x2   :  { %12 = vsyncpa [#allocation5], 0  ;;  %s30_s20 = sshll.u32 %s428_s1, 4  ;;  %s361_s21 = smov [#allocation6]   ;;  %s31_s20 = int_to_ptr.hbm [resolvable:$true] %s30_s20 }
   0x3   :  { %s32_s22 = sshll.u32 %s361_s21, 4  ;;  %s17_s25 = sshll.u32 %s427_s0, 4  ;;  %s33_s22 = int_to_ptr.vmem [resolvable:$true] %s32_s22  ;;  %s18_s25 = int_to_ptr.hbm [resolvable:$true] %s17_s25 }
   0x4   :  { %s362_s26 = smov 128   ;;  %s363_s27 = smov 8  }
   0x5   :  { %38 = dma.hbm_to_vmem [thread:$0]  %s31_s20, 2048, %s33_s22, [#allocation7], %s362_s26, %s362_s26, %s363_s27  }
   0x6   :  { %s364_s28 = smov [#allocation3]   ;;  %s45_s1 = sshll.u32 %s430_s3, 4  ;;  %s46_s1 = int_to_ptr.hbm [resolvable:$true] %s45_s1 }
   0x7   :  { %s19_s29 = sshll.u32 %s364_s28, 4  ;;  %s365_s0 = smov [#allocation8]   ;;  %s20_s29 = int_to_ptr.vmem [resolvable:$true] %s19_s29 }
   0x8   :  { %25 = dma.hbm_to_vmem [thread:$0]  %s18_s25, 256, %s20_s29, [#allocation4], %s362_s26, %s362_s26, %s363_s27  }
   0x9   :  { %s47_s7 = sshll.u32 %s365_s0, 4  ;;  %s48_s7 = int_to_ptr.vmem [resolvable:$true] %s47_s7 }
   0xa   :  { %53 = dma.hbm_to_vmem [thread:$0]  %s46_s1, 2048, %s48_s7, [#allocation7], %s362_s26, %s362_s26, %s363_s27  }
   0xb   :  { %355 = dma.done.wait [#allocation4], 256  }
   0xc   :  { %356 = vsyncadd [#allocation4], 4294967040 }
   0xd   :  { %357 = dma.done.wait [#allocation7], 4096  }
   0xe   :  { %358 = vsyncadd [#allocation7], 4294963200  ;;  %v91_v0 = vld [vmem:[#allocation6 + $0x78] sm:$0xff]  ;;  %v90_v1 = vld [vmem:[#allocation6 + $0x70] sm:$0xff]  ;;  %s366_s10 = smov [#allocation9]   ;;  %s201_s14 = sshll.u32 %s432_s5, 4  ;;  %s202_s14 = int_to_ptr.hbm [resolvable:$true] %s201_s14 }
   0xf   :  { %96 = vmatpush.msra.mxu0 %v91_v0  ;;  %215 = vmatpush.msra.mxu2 %v91_v0  ;;  %v89_v2 = vld [vmem:[#allocation6 + $0x68] sm:$0xff]  ;;  %v88_v3 = vld [vmem:[#allocation6 + $0x60] sm:$0xff]  ;;  %v87_v4 = vld [vmem:[#allocation6 + $0x58] sm:$0xff]  ;;  %s199_s11 = sshll.u32 %s366_s10, 4  ;;  %s200_s11 = int_to_ptr.vmem [resolvable:$true] %s199_s11 }
  0x10   :  { %v154_v5 = vld [vmem:[#allocation8 + $0x78] sm:$0xff]  ;;  %v153_v6 = vld [vmem:[#allocation8 + $0x70] sm:$0xff]  ;;  %v152_v8 = vld [vmem:[#allocation8 + $0x68] sm:$0xff] }
  0x11   :  { %97 = vmatpush.msra.mxu0 %v90_v1  ;;  %216 = vmatpush.msra.mxu2 %v90_v1  ;;  %v86_v7 = vld [vmem:[#allocation6 + $0x50] sm:$0xff]  ;;  %v85_v9 = vld [vmem:[#allocation6 + $0x48] sm:$0xff]  ;;  %v151_v10 = vld [vmem:[#allocation8 + $0x60] sm:$0xff] }
  0x12   :  { %155 = vmatpush.msra.mxu1 %v154_v5  ;;  %231 = vmatpush.msra.mxu3 %v154_v5  ;;  %v84_v11 = vld [vmem:[#allocation6 + $0x40] sm:$0xff]  ;;  %v83_v12 = vld [vmem:[#allocation6 + $0x38] sm:$0xff]  ;;  %v82_v13 = vld [vmem:[#allocation6 + $0x30] sm:$0xff] }
  0x13   :  { %98 = vmatpush.msra.mxu0 %v89_v2  ;;  %217 = vmatpush.msra.mxu2 %v89_v2  ;;  %v81_v14 = vld [vmem:[#allocation6 + $0x28] sm:$0xff]  ;;  %v80_v15 = vld [vmem:[#allocation6 + $0x20] sm:$0xff]  ;;  %v79_v16 = vld [vmem:[#allocation6 + $0x18] sm:$0xff] }
  0x14   :  { %156 = vmatpush.msra.mxu1 %v153_v6  ;;  %232 = vmatpush.msra.mxu3 %v153_v6  ;;  %v78_v17 = vld [vmem:[#allocation6 + $0x10] sm:$0xff]  ;;  %v77_v18 = vld [vmem:[#allocation6 + $0x8] sm:$0xff]  ;;  %v76_v19 = vld [vmem:[#allocation6] sm:$0xff] }
  0x15   :  { %99 = vmatpush.msra.mxu0 %v88_v3  ;;  %218 = vmatpush.msra.mxu2 %v88_v3  ;;  %v74_v20 = vld [vmem:[#allocation3] sm:$0xff]  ;;  %v75_v21 = vld [vmem:[#allocation3 + $0x8] sm:$0xff]  ;;  %v148_v24 = vld [vmem:[#allocation8 + $0x48] sm:$0xff] }
  0x16   :  { %157 = vmatpush.msra.mxu1 %v152_v8  ;;  %233 = vmatpush.msra.mxu3 %v152_v8  ;;  %v150_v22 = vld [vmem:[#allocation8 + $0x58] sm:$0xff]  ;;  %v149_v23 = vld [vmem:[#allocation8 + $0x50] sm:$0xff]  ;;  %v147_v25 = vld [vmem:[#allocation8 + $0x40] sm:$0xff] }
  0x17   :  { %100 = vmatpush.msra.mxu0 %v87_v4  ;;  %219 = vmatpush.msra.mxu2 %v87_v4  ;;  %v146_v26 = vld [vmem:[#allocation8 + $0x38] sm:$0xff]  ;;  %v145_v27 = vld [vmem:[#allocation8 + $0x30] sm:$0xff]  ;;  %v144_v28 = vld [vmem:[#allocation8 + $0x28] sm:$0xff] }
  0x18   :  { %158 = vmatpush.msra.mxu1 %v151_v10  ;;  %234 = vmatpush.msra.mxu3 %v151_v10  ;;  %v143_v29 = vld [vmem:[#allocation8 + $0x20] sm:$0xff]  ;;  %v142_v30 = vld [vmem:[#allocation8 + $0x18] sm:$0xff]  ;;  %v141_v31 = vld [vmem:[#allocation8 + $0x10] sm:$0xff] }
  0x19   :  { %101 = vmatpush.msra.mxu0 %v86_v7  ;;  %220 = vmatpush.msra.mxu2 %v86_v7  ;;  %v140_v32 = vld [vmem:[#allocation8 + $0x8] sm:$0xff]  ;;  %v139_v33 = vld [vmem:[#allocation8] sm:$0xff]  ;;  %v253_v34 = vld [vmem:[%s429_s2] ss:$0 sm:$0xff] }
  0x1a   :  { %159 = vmatpush.msra.mxu1 %v150_v22  ;;  %235 = vmatpush.msra.mxu3 %v150_v22  ;;  %v254_v57 = vld [vmem:[%s431_s4] ss:$0 sm:$0xff] }
  0x1b   :  { %102 = vmatpush.msra.mxu0 %v85_v9  ;;  %221 = vmatpush.msra.mxu2 %v85_v9 }
  0x1c   :  { %160 = vmatpush.msra.mxu1 %v149_v23  ;;  %236 = vmatpush.msra.mxu3 %v149_v23 }
  0x1d   :  { %103 = vmatpush.msra.mxu0 %v84_v11  ;;  %222 = vmatpush.msra.mxu2 %v84_v11 }
  0x1e   :  { %161 = vmatpush.msra.mxu1 %v148_v24  ;;  %237 = vmatpush.msra.mxu3 %v148_v24 }
  0x1f   :  { %104 = vmatpush.msra.mxu0 %v83_v12  ;;  %223 = vmatpush.msra.mxu2 %v83_v12 }
  0x20   :  { %162 = vmatpush.msra.mxu1 %v147_v25  ;;  %238 = vmatpush.msra.mxu3 %v147_v25 }
  0x21   :  { %105 = vmatpush.msra.mxu0 %v82_v13  ;;  %224 = vmatpush.msra.mxu2 %v82_v13 }
  0x22   :  { %163 = vmatpush.msra.mxu1 %v146_v26  ;;  %239 = vmatpush.msra.mxu3 %v146_v26 }
  0x23   :  { %106 = vmatpush.msra.mxu0 %v81_v14  ;;  %225 = vmatpush.msra.mxu2 %v81_v14 }
  0x24   :  { %164 = vmatpush.msra.mxu1 %v145_v27  ;;  %240 = vmatpush.msra.mxu3 %v145_v27 }
  0x25   :  { %107 = vmatpush.msra.mxu0 %v80_v15  ;;  %226 = vmatpush.msra.mxu2 %v80_v15 }
  0x26   :  { %165 = vmatpush.msra.mxu1 %v144_v28  ;;  %241 = vmatpush.msra.mxu3 %v144_v28 }
  0x27   :  { %108 = vmatpush.msra.mxu0 %v79_v16  ;;  %227 = vmatpush.msra.mxu2 %v79_v16 }
  0x28   :  { %166 = vmatpush.msra.mxu1 %v143_v29  ;;  %242 = vmatpush.msra.mxu3 %v143_v29 }
  0x29   :  { %109 = vmatpush.msra.mxu0 %v78_v17  ;;  %228 = vmatpush.msra.mxu2 %v78_v17 }
  0x2a   :  { %167 = vmatpush.msra.mxu1 %v142_v30  ;;  %243 = vmatpush.msra.mxu3 %v142_v30 }
  0x2b   :  { %110 = vmatpush.msra.mxu0 %v77_v18  ;;  %229 = vmatpush.msra.mxu2 %v77_v18 }
  0x2c   :  { %168 = vmatpush.msra.mxu1 %v141_v31  ;;  %244 = vmatpush.msra.mxu3 %v141_v31 }
  0x2d   :  { %111 = vmatpush.msra.mxu0 %v76_v19  ;;  %230 = vmatpush.msra.mxu2 %v76_v19 }
  0x2e   :  { %112 = vmatmul.f32.vlgmr.msra.gmra.mxu0 %v74_v20  ;;  %115 = vmatmul.f32.vlgmr.msra.gmra.mxu2 %v75_v21 }
  0x2f   :  { %169 = vmatpush.msra.mxu1 %v140_v32  ;;  %245 = vmatpush.msra.mxu3 %v140_v32 }
  0x31   :  { %170 = vmatpush.msra.mxu1 %v139_v33  ;;  %246 = vmatpush.msra.mxu3 %v139_v33 }
  0xab   :  { %v113_v35 = vpop.f32.mrf.mxu0 }
  0xac   :  { %v114_v36 = vadd.f32 %v253_v34, %v113_v35 }
  0xae   :  { %v121_v37 = vmul.f32 0.044715, %v114_v36  ;;  %v119_v50 = vmul.f32 0.5, %v114_v36 }
  0xb0   :  { %v123_v38 = vmul.f32 %v121_v37, %v114_v36 }
  0xb1   :  { %v116_v39 = vpop.f32.mrf.mxu2 }
  0xb2   :  { %v117_v40 = vadd.f32 %v253_v34, %v116_v39  ;;  %v125_v41 = vmul.f32 %v123_v38, %v114_v36 }
  0xb4   :  { %v127_v42 = vadd.f32 %v125_v41, %v114_v36  ;;  %v122_v43 = vmul.f32 0.044715, %v117_v40  ;;  %v120_v54 = vmul.f32 0.5, %v117_v40 }
  0xb6   :  { %v129_v44 = vmul.f32 0.7978846, %v127_v42  ;;  %v124_v45 = vmul.f32 %v122_v43, %v117_v40 }
  0xb8   :  { %255 = vtanh.f32 %v129_v44  ;;  %v126_v46 = vmul.f32 %v124_v45, %v117_v40 }
  0xba   :  { %v128_v47 = vadd.f32 %v126_v46, %v117_v40 }
  0xbc   :  { %v130_v48 = vmul.f32 0.7978846, %v128_v47 }
  0xbe   :  { %v256_v49 = vpop.eup %255  ;;  %257 = vtanh.f32 %v130_v48 }
  0xbf   :  { %v133_v51 = vadd.f32 1.0, %v256_v49 }
  0xc1   :  { %v135_v52 = vmul.f32 %v133_v51, %v119_v50 }
  0xc3   :  { %171 = vmatmul.f32.vlgmr.msra.gmra.mxu1 %v135_v52 }
  0xc4   :  { %v258_v53 = vpop.eup %257 }
  0xc5   :  { %v134_v55 = vadd.f32 1.0, %v258_v53 }
  0xc7   :  { %v136_v56 = vmul.f32 %v134_v55, %v120_v54 }
  0xc9   :  { %174 = vmatmul.f32.vlgmr.msra.gmra.mxu3 %v136_v56 }
 0x140   :  { %v172_v58 = vpop.f32.mrf.mxu1 }
 0x141   :  { %v191_v59 = vadd.f32 %v254_v57, %v172_v58 }
 0x143   :  { %193 = vst [vmem:[#allocation9] sm:$0xff] %v191_v59 }
 0x14c   :  { %v175_v60 = vpop.f32.mrf.mxu3 }
 0x14d   :  { %v192_v61 = vadd.f32 %v254_v57, %v175_v60 }
 0x14f   :  { %194 = vst [vmem:[#allocation9 + $0x8] sm:$0xff] %v192_v61 }
 0x150   :  { %207 = dma.vmem_to_hbm [thread:$0]  %s200_s11, 256, %s202_s14, [#allocation5], %s362_s26, %s362_s26, %s363_s27  }
 0x151   :  { %359 = dma.done.wait [#allocation5], 256  }
 0x152   :  { %360 = vsyncadd [#allocation5], 4294967040 }
 0x153   :  { %212 = vsyncpa [#allocation4], 1 }
 0x154   :  { %213 = vsyncpa [#allocation7], 1 }
 0x155   :  { %214 = vsyncpa [#allocation5], 1 }

</bundles_post_ra>
